<compile_context>
chip_gen: v5e
topology: v5e:2x2
jax: 0.10.0
libtpu: 0.0.40
codegen_flags: <defaults>
</compile_context>

<pallas_src>
import math
import jax
import jax.numpy as jnp
from jax.experimental import pallas as pl
from jax.experimental.pallas import tpu as pltpu


# ----------------------------------------------------------------------------
# Pallas kernel: one-hot(t) @ table -> @ W1 + b1 -> swish -> @ W2 + b2
# ----------------------------------------------------------------------------
def time_embedding_kernel(t_ref, table_ref, w1_ref, b1_ref, w2_ref, b2_ref, o_ref):
    tile_b = o_ref.shape[0]
    T = table_ref.shape[0]

    # Fused embedding lookup: build a (tile_b, T) one-hot from the int32 timesteps
    # and select rows of the sinusoidal table with a single MXU matmul.
    t = t_ref[...]                                                  # (tile_b, 1) int32
    pos = jax.lax.broadcasted_iota(jnp.int32, (tile_b, T), 1)       # (tile_b, T)
    onehot = (pos == t).astype(table_ref.dtype)                     # (tile_b, T)
    emb = jnp.dot(onehot, table_ref[...],
                  preferred_element_type=jnp.float32)               # (tile_b, d_model)

    # MLP: Linear -> Swish -> Linear (biases loaded once per invocation).
    b1 = b1_ref[...]                                                # (1, dim_p)
    b2 = b2_ref[...]                                                # (1, dim_p)
    h = jnp.dot(emb, w1_ref[...], preferred_element_type=jnp.float32) + b1
    h = h * jax.nn.sigmoid(h)                                       # Swish
    o = jnp.dot(h, w2_ref[...], preferred_element_type=jnp.float32) + b2
    o_ref[...] = o.astype(o_ref.dtype)                              # lane-dense store


def time_embedding_forward(t, emb_table, w1, b1, w2, b2):
    """Forward pass of TimeEmbedding.

    t:          int32 [B]
    emb_table:  f32 [T, d_model]
    w1:         f32 [d_model, dim]   (= torch Linear1.weight.T)
    b1:         f32 [dim]
    w2:         f32 [dim, dim]       (= torch Linear2.weight.T)
    b2:         f32 [dim]
    returns     f32 [B, dim]
    """
    B = t.shape[0]
    T, d_model = emb_table.shape
    dim = w1.shape[1]

    LANE, SUBLANE = 128, 8

    # Lane-dense output width (unmasked stores): pad dim up to a multiple of 128.
    dim_p = LANE * pl.cdiv(dim, LANE)
    if dim_p != dim:
        pad_n = dim_p - dim
        w1 = jnp.pad(w1, ((0, 0), (0, pad_n)))
        b1 = jnp.pad(b1, ((0, pad_n),))
        w2 = jnp.pad(w2, ((0, pad_n), (0, pad_n)))
        b2 = jnp.pad(b2, ((0, pad_n),))

    # One big batch tile (grid=(1,)) whenever B <= 128; 128-row tiles otherwise.
    tile_b = min(LANE, SUBLANE * pl.cdiv(B, SUBLANE))
    B_pad = tile_b * pl.cdiv(B, tile_b)

    t_pad = t.astype(jnp.int32)
    if B_pad != B:
        t_pad = jnp.pad(t_pad, ((0, B_pad - B),))      # padded rows look up index 0
    t_2d = t_pad.reshape(B_pad, 1)

    b1_2d = b1.reshape(1, dim_p)
    b2_2d = b2.reshape(1, dim_p)

    grid = (B_pad // tile_b,)

    cost = pl.CostEstimate(
        flops=2 * B_pad * (T * d_model + d_model * dim_p + dim_p * dim_p),
        transcendentals=B_pad * dim_p,
        bytes_accessed=4 * (B_pad + T * d_model + d_model * dim_p + dim_p
                            + dim_p * dim_p + dim_p + B_pad * dim_p),
    )

    out = pl.pallas_call(
        time_embedding_kernel,
        out_shape=jax.ShapeDtypeStruct((B_pad, dim_p), jnp.float32),
        grid_spec=pltpu.PrefetchScalarGridSpec(
            num_scalar_prefetch=0,
            grid=grid,
            in_specs=[
                pl.BlockSpec((tile_b, 1), lambda i: (i, 0)),        # timesteps
                pl.BlockSpec((T, d_model), lambda i: (0, 0)),       # sinusoidal table
                pl.BlockSpec((d_model, dim_p), lambda i: (0, 0)),   # W1 (resident)
                pl.BlockSpec((1, dim_p), lambda i: (0, 0)),         # b1
                pl.BlockSpec((dim_p, dim_p), lambda i: (0, 0)),     # W2 (resident)
                pl.BlockSpec((1, dim_p), lambda i: (0, 0)),         # b2
            ],
            out_specs=pl.BlockSpec((tile_b, dim_p), lambda i: (i, 0)),
        ),
        compiler_params=pltpu.CompilerParams(
            dimension_semantics=("parallel",)),
        cost_estimate=cost,
    )(t_2d, emb_table, w1, b1_2d, w2, b2_2d)

    if B_pad != B or dim_p != dim:
        out = out[:B, :dim]
    return out


# ----------------------------------------------------------------------------
# Deterministic parameter construction (mirrors TimeEmbedding.__init__)
# ----------------------------------------------------------------------------
def make_sinusoidal_table(T, d_model):
    assert d_model % 2 == 0
    emb = jnp.arange(0, d_model, 2, dtype=jnp.float32) / d_model * math.log(10000.0)
    emb = jnp.exp(-emb)                                           # (d_model//2,)
    pos = jnp.arange(T, dtype=jnp.float32)                        # (T,)
    emb = pos[:, None] * emb[None, :]                             # (T, d_model//2)
    emb = jnp.stack([jnp.sin(emb), jnp.cos(emb)], axis=-1)        # (T, d_model//2, 2)
    return emb.reshape(T, d_model)                                # (T, d_model)


def make_linear_params(key, in_features, out_features):
    # PyTorch nn.Linear default: U(-1/sqrt(in), 1/sqrt(in)) for weight and bias.
    kw, kb = jax.random.split(key)
    bound = 1.0 / math.sqrt(in_features)
    w = jax.random.uniform(kw, (in_features, out_features), jnp.float32,
                           minval=-bound, maxval=bound)
    b = jax.random.uniform(kb, (out_features,), jnp.float32,
                           minval=-bound, maxval=bound)
    return w, b


def reference_forward(t, emb_table, w1, b1, w2, b2):
    emb = jnp.take(emb_table, t, axis=0)
    h = emb @ w1 + b1
    h = h * jax.nn.sigmoid(h)
    return h @ w2 + b2


if __name__ == "__main__":
    T, d_model, dim = 100, 32, 64
    B = 8

    key = jax.random.PRNGKey(0)
    k_t, k_l1, k_l2 = jax.random.split(key, 3)

    emb_table = make_sinusoidal_table(T, d_model)
    w1, b1 = make_linear_params(k_l1, d_model, dim)
    w2, b2 = make_linear_params(k_l2, dim, dim)

    t = jax.random.randint(k_t, (B,), 0, T, dtype=jnp.int32)

    out = time_embedding_forward(t, emb_table, w1, b1, w2, b2)
    out = jax.block_until_ready(out)

    ref = reference_forward(t, emb_table, w1, b1, w2, b2)
    assert out.shape == (B, dim)
    err = float(jnp.max(jnp.abs(out - ref)))
    assert jnp.allclose(out, ref, atol=1e-4, rtol=1e-4), err

    print("KERNEL_OK")
</pallas_src>

<mosaic_0001>
module attributes {stable_mosaic.version = 11 : i64} {
  func.func @time_embedding_kernel(%arg0: i32, %arg1: memref<8x1xi32, #tpu.memory_space<vmem>>, %arg2: memref<100x32xf32, #tpu.memory_space<vmem>>, %arg3: memref<32x128xf32, #tpu.memory_space<vmem>>, %arg4: memref<1x128xf32, #tpu.memory_space<vmem>>, %arg5: memref<128x128xf32, #tpu.memory_space<vmem>>, %arg6: memref<1x128xf32, #tpu.memory_space<vmem>>, %arg7: memref<8x128xf32, #tpu.memory_space<vmem>>) attributes {dimension_semantics = [#tpu.dimension_semantics<parallel>], iteration_bounds = array<i64: 1>, scalar_prefetch = 0 : i64, scratch_operands = 0 : i64, tpu.core_type = #tpu.core_type<tc>, window_params = [{transform_indices = @transform_0, window_bounds = array<i64: 8, 1>}, {pipeline_mode = #tpu.pipeline_mode<synchronous>, transform_indices = @transform_1, window_bounds = array<i64: 100, 32>}, {pipeline_mode = #tpu.pipeline_mode<synchronous>, transform_indices = @transform_2, window_bounds = array<i64: 32, 128>}, {pipeline_mode = #tpu.pipeline_mode<synchronous>, transform_indices = @transform_3, window_bounds = array<i64: 1, 128>}, {pipeline_mode = #tpu.pipeline_mode<synchronous>, transform_indices = @transform_4, window_bounds = array<i64: 128, 128>}, {pipeline_mode = #tpu.pipeline_mode<synchronous>, transform_indices = @transform_5, window_bounds = array<i64: 1, 128>}, {transform_indices = @transform_6, window_bounds = array<i64: 8, 128>}]} {
    %c0 = arith.constant 0 : index
    %c0_0 = arith.constant 0 : index
    %0 = vector.load %arg1[%c0, %c0_0] : memref<8x1xi32, #tpu.memory_space<vmem>>, vector<8x1xi32>
    %1 = tpu.iota {dimensions = array<i32: 1>} : vector<8x100xi32>
    %2 = vector.broadcast %0 : vector<8x1xi32> to vector<8x100xi32>
    %3 = arith.cmpi eq, %1, %2 : vector<8x100xi32>
    %4 = arith.extui %3 : vector<8x100xi1> to vector<8x100xi32>
    %5 = arith.sitofp %4 : vector<8x100xi32> to vector<8x100xf32>
    %c0_1 = arith.constant 0 : index
    %c0_2 = arith.constant 0 : index
    %6 = vector.load %arg2[%c0_1, %c0_2] : memref<100x32xf32, #tpu.memory_space<vmem>>, vector<100x32xf32>
    %cst = arith.constant dense<0.000000e+00> : vector<8x32xf32>
    %7 = tpu.matmul %5, %6, %cst {dimension_numbers = #tpu.dot_dimension_numbers<[1], [0], [0], [1], [0, 0, 1, 1], [], []>} : vector<8x100xf32>, vector<100x32xf32>, vector<8x32xf32> -> vector<8x32xf32>
    %c0_3 = arith.constant 0 : index
    %c0_4 = arith.constant 0 : index
    %8 = vector.load %arg4[%c0_3, %c0_4] : memref<1x128xf32, #tpu.memory_space<vmem>>, vector<1x128xf32>
    %c0_5 = arith.constant 0 : index
    %c0_6 = arith.constant 0 : index
    %9 = vector.load %arg6[%c0_5, %c0_6] : memref<1x128xf32, #tpu.memory_space<vmem>>, vector<1x128xf32>
    %c0_7 = arith.constant 0 : index
    %c0_8 = arith.constant 0 : index
    %10 = vector.load %arg3[%c0_7, %c0_8] : memref<32x128xf32, #tpu.memory_space<vmem>>, vector<32x128xf32>
    %cst_9 = arith.constant dense<0.000000e+00> : vector<8x128xf32>
    %11 = tpu.matmul %7, %10, %cst_9 {dimension_numbers = #tpu.dot_dimension_numbers<[1], [0], [0], [1], [0, 0, 1, 1], [], []>} : vector<8x32xf32>, vector<32x128xf32>, vector<8x128xf32> -> vector<8x128xf32>
    %12 = vector.broadcast %8 : vector<1x128xf32> to vector<8x128xf32>
    %13 = arith.addf %11, %12 : vector<8x128xf32>
    %14 = arith.negf %13 : vector<8x128xf32>
    %15 = math.exp %14 : vector<8x128xf32>
    %cst_10 = arith.constant 1.000000e+00 : f32
    %16 = vector.broadcast %cst_10 : f32 to vector<8x128xf32>
    %17 = arith.addf %16, %15 : vector<8x128xf32>
    %18 = arith.divf %16, %17 : vector<8x128xf32>
    %19 = arith.mulf %13, %18 : vector<8x128xf32>
    %c0_11 = arith.constant 0 : index
    %c0_12 = arith.constant 0 : index
    %20 = vector.load %arg5[%c0_11, %c0_12] : memref<128x128xf32, #tpu.memory_space<vmem>>, vector<128x128xf32>
    %cst_13 = arith.constant dense<0.000000e+00> : vector<8x128xf32>
    %21 = tpu.matmul %19, %20, %cst_13 {dimension_numbers = #tpu.dot_dimension_numbers<[1], [0], [0], [1], [0, 0, 1, 1], [], []>} : vector<8x128xf32>, vector<128x128xf32>, vector<8x128xf32> -> vector<8x128xf32>
    %22 = vector.broadcast %9 : vector<1x128xf32> to vector<8x128xf32>
    %23 = arith.addf %21, %22 : vector<8x128xf32>
    %c0_14 = arith.constant 0 : index
    %c0_15 = arith.constant 0 : index
    %24 = vector.load %arg7[%c0_14, %c0_15] : memref<8x128xf32, #tpu.memory_space<vmem>>, vector<8x128xf32>
    tpu.vector_store %arg7[%c0_14, %c0_15], %23 {strides = array<i32>} : memref<8x128xf32, #tpu.memory_space<vmem>>, vector<8x128xf32>,
    return
  }
  func.func @transform_0(%arg0: i32) -> (i32, i32) {
    %c0_i32 = arith.constant 0 : i32
    %c0_i32_0 = arith.constant 0 : i32
    return %arg0, %c0_i32 : i32, i32
  }
  func.func @transform_1(%arg0: i32) -> (i32, i32) {
    %c0_i32 = arith.constant 0 : i32
    %c0_i32_0 = arith.constant 0 : i32
    %c0_i32_1 = arith.constant 0 : i32
    return %c0_i32, %c0_i32_0 : i32, i32
  }
  func.func @transform_2(%arg0: i32) -> (i32, i32) {
    %c0_i32 = arith.constant 0 : i32
    %c0_i32_0 = arith.constant 0 : i32
    %c0_i32_1 = arith.constant 0 : i32
    return %c0_i32, %c0_i32_0 : i32, i32
  }
  func.func @transform_3(%arg0: i32) -> (i32, i32) {
    %c0_i32 = arith.constant 0 : i32
    %c0_i32_0 = arith.constant 0 : i32
    %c0_i32_1 = arith.constant 0 : i32
    return %c0_i32, %c0_i32_0 : i32, i32
  }
  func.func @transform_4(%arg0: i32) -> (i32, i32) {
    %c0_i32 = arith.constant 0 : i32
    %c0_i32_0 = arith.constant 0 : i32
    %c0_i32_1 = arith.constant 0 : i32
    return %c0_i32, %c0_i32_0 : i32, i32
  }
  func.func @transform_5(%arg0: i32) -> (i32, i32) {
    %c0_i32 = arith.constant 0 : i32
    %c0_i32_0 = arith.constant 0 : i32
    %c0_i32_1 = arith.constant 0 : i32
    return %c0_i32, %c0_i32_0 : i32, i32
  }
  func.func @transform_6(%arg0: i32) -> (i32, i32) {
    %c0_i32 = arith.constant 0 : i32
    %c0_i32_0 = arith.constant 0 : i32
    return %arg0, %c0_i32 : i32, i32
  }
}

</mosaic_0001>

<bundles_post_ra>
// kernel: tpu_custom_call.1
= control target key start
LH: loop header
LB: loop body
LE: loop exit
PB: predicated region body
PF: predicated region fallthrough
CT: control target
= control target key end

     0   :  { %11 = vsyncpa [#allocation3], 0  ;;  %s413_s0 = inlined_call_operand.vmem [shape: s32[8,1], index: 0, kind: input, shape index: {}]   ;;  %s414_s1 = inlined_call_operand.vmem [shape: f32[100,32], index: 1, kind: input, shape index: {}]   ;;  %s415_s2 = inlined_call_operand.hbm [shape: f32[32,128], index: 2, kind: input, shape index: {}]   ;;  %s416_s3 = inlined_call_operand.vmem [shape: f32[1,128], index: 3, kind: input, shape index: {}]   ;;  %s417_s4 = inlined_call_operand.vmem [shape: f32[128,128], index: 4, kind: input, shape index: {}]   ;;  %s418_s5 = inlined_call_operand.vmem [shape: f32[1,128], index: 5, kind: input, shape index: {}]   ;;  %s419_s6 = inlined_call_operand.hbm [shape: f32[8,128], index: 6, kind: output, shape index: {}]  }
   0x1   :  { %12 = vsyncpa [#allocation4], 0  ;;  %s21_s23 = sshll.u32 %s415_s2, 4  ;;  %s270_s24 = smov [#allocation2]   ;;  %s22_s23 = int_to_ptr.hbm [resolvable:$true] %s21_s23 }
   0x2   :  { %s23_s25 = sshll.u32 %s270_s24, 4  ;;  %s271_s26 = smov 128   ;;  %s24_s25 = int_to_ptr.vmem [resolvable:$true] %s23_s25 }
   0x3   :  { %s272_s27 = smov 8  }
   0x4   :  { %29 = dma.hbm_to_vmem [thread:$0]  %s22_s23, 512, %s24_s25, [#allocation3], %s271_s26, %s271_s26, %s272_s27  }
   0x5   :  { %266 = dma.done.wait [#allocation3], 512  }
   0x6   :  { %267 = vsyncadd [#allocation3], 4294966784  ;;  %v273_v0 = vmov 0   ;;  %vm66_vm0 = vcmask 1043456   ;;  %v40_v1 = vld [vmem:[%s413_s0] sm:$0xff]  ;;  %v60_v3 = vld [vmem:[%s414_s1 + $0x58] sm:$0xff]  ;;  %v41_v18 = vlaneseq }
   0x7   :  { %211 = vset.pattern.permute.xlu0 %v273_v0  ;;  %v61_v2 = vld [vmem:[%s414_s1 + $0x60] sm:$0xf]  ;;  %v59_v4 = vld [vmem:[%s414_s1 + $0x50] sm:$0xff]  ;;  %v58_v5 = vld [vmem:[%s414_s1 + $0x48] sm:$0xff]  ;;  %vm62_vm1 = vcmask 818176   ;;  %v274_v21 = vmov 0.0  }
   0x8   :  { %44 = vperm.xlu0 %211, %v40_v1   ;;  %201 = vmatpush.msk.msra.mxu0 %vm66_vm0, %v61_v2  ;;  %v57_v6 = vld [vmem:[%s414_s1 + $0x40] sm:$0xff]  ;;  %v56_v7 = vld [vmem:[%s414_s1 + $0x38] sm:$0xff]  ;;  %v55_v8 = vld [vmem:[%s414_s1 + $0x30] sm:$0xff]  ;;  %v42_v19 = vand.u32 127, %v41_v18  ;;  %vm99_vm3 = vcmask 261120   ;;  %s275_s11 = smov [#allocation5]  }
   0x9   :  { %v54_v9 = vld [vmem:[%s414_s1 + $0x28] sm:$0xff]  ;;  %v53_v10 = vld [vmem:[%s414_s1 + $0x20] sm:$0xff]  ;;  %v52_v11 = vld [vmem:[%s414_s1 + $0x18] sm:$0xff]  ;;  %s188_s12 = sshll.u32 %s275_s11, 4  ;;  %s190_s14 = sshll.u32 %s419_s6, 4  ;;  %s189_s12 = int_to_ptr.vmem [resolvable:$true] %s188_s12  ;;  %s191_s14 = int_to_ptr.hbm [resolvable:$true] %s190_s14 }
   0xa   :  { %74 = vmatpush.msra.mxu0 %v60_v3  ;;  %v51_v12 = vld [vmem:[%s414_s1 + $0x10] sm:$0xff]  ;;  %v50_v13 = vld [vmem:[%s414_s1 + $0x8] sm:$0xff]  ;;  %v49_v14 = vld [vmem:[%s414_s1] sm:$0xff] }
   0xb   :  { %v95_v15 = vld [vmem:[#allocation2 + $0x18] sm:$0xff]  ;;  %v94_v16 = vld [vmem:[#allocation2 + $0x10] sm:$0xff]  ;;  %v93_v17 = vld [vmem:[#allocation2 + $0x8] sm:$0xff] }
   0xc   :  { %75 = vmatpush.msra.mxu0 %v59_v4  ;;  %115 = vmatpush.msra.mxu1 %v95_v15  ;;  %v92_v23 = vld [vmem:[#allocation2] sm:$0xff]  ;;  %v158_v25 = vld [vmem:[%s417_s4 + $0x78] sm:$0xff]  ;;  %v157_v26 = vld [vmem:[%s417_s4 + $0x70] sm:$0xff] }
   0xd   :  { %162 = vmatpush.msra.mxu2 %v158_v25  ;;  %v156_v27 = vld [vmem:[%s417_s4 + $0x68] sm:$0xff]  ;;  %v155_v28 = vld [vmem:[%s417_s4 + $0x60] sm:$0xff]  ;;  %v154_v29 = vld [vmem:[%s417_s4 + $0x58] sm:$0xff] }
   0xe   :  { %76 = vmatpush.msra.mxu0 %v58_v5  ;;  %116 = vmatpush.msra.mxu1 %v94_v16  ;;  %v153_v30 = vld [vmem:[%s417_s4 + $0x50] sm:$0xff]  ;;  %v152_v31 = vld [vmem:[%s417_s4 + $0x48] sm:$0xff]  ;;  %v151_v32 = vld [vmem:[%s417_s4 + $0x40] sm:$0xff] }
   0xf   :  { %163 = vmatpush.msra.mxu2 %v157_v26  ;;  %v150_v33 = vld [vmem:[%s417_s4 + $0x38] sm:$0xff]  ;;  %v149_v34 = vld [vmem:[%s417_s4 + $0x30] sm:$0xff]  ;;  %v148_v35 = vld [vmem:[%s417_s4 + $0x28] sm:$0xff] }
  0x10   :  { %77 = vmatpush.msra.mxu0 %v57_v6  ;;  %117 = vmatpush.msra.mxu1 %v93_v17  ;;  %v147_v36 = vld [vmem:[%s417_s4 + $0x20] sm:$0xff]  ;;  %v146_v37 = vld [vmem:[%s417_s4 + $0x18] sm:$0xff]  ;;  %v145_v38 = vld [vmem:[%s417_s4 + $0x10] sm:$0xff] }
  0x11   :  { %164 = vmatpush.msra.mxu2 %v156_v27  ;;  %v144_v39 = vld [vmem:[%s417_s4 + $0x8] sm:$0xff]  ;;  %v212_v40 = vld [vmem:[%s416_s3] ss:$0 sm:$0xff] }
  0x12   :  { %78 = vmatpush.msra.mxu0 %v56_v7  ;;  %118 = vmatpush.msra.mxu1 %v92_v23  ;;  %v143_v41 = vld [vmem:[%s417_s4] sm:$0xff] }
  0x13   :  { %165 = vmatpush.msra.mxu2 %v155_v28  ;;  %v213_v58 = vld [vmem:[%s418_s5] ss:$0 sm:$0xff] }
  0x14   :  { %79 = vmatpush.msra.mxu0 %v55_v8 }
  0x15   :  { %166 = vmatpush.msra.mxu2 %v154_v29 }
  0x16   :  { %80 = vmatpush.msra.mxu0 %v54_v9 }
  0x17   :  { %167 = vmatpush.msra.mxu2 %v153_v30 }
  0x18   :  { %81 = vmatpush.msra.mxu0 %v53_v10 }
  0x19   :  { %168 = vmatpush.msra.mxu2 %v152_v31 }
  0x1a   :  { %82 = vmatpush.msra.mxu0 %v52_v11 }
  0x1b   :  { %169 = vmatpush.msra.mxu2 %v151_v32 }
  0x1c   :  { %83 = vmatpush.msra.mxu0 %v51_v12 }
  0x1d   :  { %170 = vmatpush.msra.mxu2 %v150_v33 }
  0x1e   :  { %84 = vmatpush.msra.mxu0 %v50_v13 }
  0x1f   :  { %171 = vmatpush.msra.mxu2 %v149_v34 }
  0x20   :  { %85 = vmatpush.msra.mxu0 %v49_v14 }
  0x21   :  { %172 = vmatpush.msra.mxu2 %v148_v35 }
  0x23   :  { %173 = vmatpush.msra.mxu2 %v147_v36 }
  0x25   :  { %174 = vmatpush.msra.mxu2 %v146_v37 }
  0x27   :  { %175 = vmatpush.msra.mxu2 %v145_v38 }
  0x29   :  { %176 = vmatpush.msra.mxu2 %v144_v39 }
  0x2b   :  { %177 = vmatpush.msra.mxu2 %v143_v41 }
  0x7a   :  { %v45_v20 = vpop.permute.xlu0 %44 }
  0x7b   :  { %vm46_vm2 = vcmp.eq.s32.totalorder %v42_v19, %v45_v20 }
  0x7c   :  { %v200_v22 = vsel %vm46_vm2, 1.0, %v274_v21 }
  0x7d   :  { %202 = vmatmul.msk.f32.vlgmr.msra.gmra.mxu0 %vm62_vm1, %v200_v22 }
  0xfa   :  { %v87_v24 = vpop.f32.mrf.mxu0 }
  0xfb   :  { %203 = vmatmul.msk.f32.vlgmr.msra.gmra.mxu1 %vm99_vm3, %v87_v24 }
 0x178   :  { %v120_v42 = vpop.f32.mrf.mxu1 }
 0x179   :  { %v121_v43 = vadd.f32 %v212_v40, %v120_v42 }
 0x17b   :  { %v204_v44 = vmul.f32 -1.442695, %v121_v43 }
 0x17d   :  { %214 = vpow2.f32 %v204_v44 }
 0x183   :  { %v215_v45 = vpop.eup %214 }
 0x184   :  { %v126_v46 = vadd.f32 1.0, %v215_v45 }
 0x186   :  { %216 = vrcp.f32 %v126_v46  ;;  %v138_v50 = vand.u32 2147483648, %v126_v46  ;;  %v136_v52 = vand.u32 2147483647, %v126_v46  ;;  %vm132_vm5 = vweird.f32 %v126_v46 }
 0x188   :  { %v139_v54 = vor.u32 1.1754944e-38, %v138_v50  ;;  %vm137_vm7 = vcmp.eq.f32.partialorder %v136_v52, 8.507059e+37 }
 0x18c   :  { %v217_v47 = vpop.eup %216 }
 0x18d   :  { %v128_v48 = vmul.f32 %v217_v47, %v126_v46  ;;  %vm133_vm4 = vweird.f32 %v217_v47 }
 0x18e   :  { %vm134_vm6 = vmor %vm132_vm5, %vm133_vm4 }
 0x18f   :  { %v129_v49 = vsub.f32 1.0, %v128_v48 }
 0x191   :  { %v130_v51 = vmul.f32 %v217_v47, %v129_v49 }
 0x193   :  { %v131_v53 = vadd.f32 %v217_v47, %v130_v51 }
 0x195   :  { %v135_v55 = vsel %vm134_vm6, %v217_v47, %v131_v53 }
 0x196   :  { %v140_v56 = vsel %vm137_vm7, %v139_v54, %v135_v55 }
 0x197   :  { %v142_v57 = vmul.f32 %v140_v56, %v121_v43 }
 0x199   :  { %178 = vmatmul.f32.vlgmr.msra.gmra.mxu2 %v142_v57 }
 0x21c   :  { %v179_v59 = vpop.f32.mrf.mxu2 }
 0x21d   :  { %v180_v60 = vadd.f32 %v213_v58, %v179_v59 }
 0x21f   :  { %182 = vst [vmem:[#allocation5] sm:$0xff] %v180_v60 }
 0x220   :  { %193 = dma.vmem_to_hbm [thread:$0]  %s189_s12, 128, %s191_s14, [#allocation4]  }
 0x221   :  { %268 = dma.done.wait [#allocation4], 128  }
 0x222   :  { %269 = vsyncadd [#allocation4], 4294967168 }
 0x223   :  { %198 = vsyncpa [#allocation3], 1 }
 0x224   :  { %199 = vsyncpa [#allocation4], 1 }

</bundles_post_ra>
